<compile_context>
chip_gen: v5e
topology: v5e:2x2
jax: 0.10.0
libtpu: 0.0.40
codegen_flags: <defaults>
</compile_context>

<pallas_src>
import functools

import jax
import jax.numpy as jnp
from jax.experimental import pallas as pl
from jax.experimental.pallas import tpu as pltpu

_LANE = 128
_SUBLANE = 8


def _plan_tiles(n, batch, *, max_sublanes=1024, min_sublanes=512, min_steps=8):
    """Pick (n_padded, tile_sublanes TS).

    Points (B, R, N) are viewed as (B, R, M, 128) with M = n_padded // 128 and
    tiled along M in chunks of TS.  TS must divide M and be a multiple of 8 or
    equal to M.  Per-step payload ~ 24*TS*128 bytes (~3 MiB at TS=1024),
    double-buffered ~6 MiB -> fits v5e (16 MiB scoped), v6e (32 MiB scoped),
    v7x (32 MiB scoped / 64 MiB physical).
    """
    m = -(-n // _LANE)                       # ceil(N / 128)
    if m <= max_sublanes:
        ts = m                               # single sublane tile (== full dim)
    else:
        # Largest multiple-of-8 divisor of m under the cap (no extra padding).
        best = 0
        d = _SUBLANE
        while d <= max_sublanes:
            if m % d == 0:
                best = d
            d += _SUBLANE
        if best < min_sublanes:
            # Ugly factorization: pad M up to a multiple of max_sublanes
            # rather than dropping back to tiny, step-overhead-bound tiles.
            m = -(-m // max_sublanes) * max_sublanes
            best = max_sublanes
        ts = best
    # Prefer >= min_steps total grid steps (v7x megacore + pipelining) while
    # tiles stay >= 64 sublanes (~200 KiB payload).
    while (batch * (m // ts) < min_steps and ts % 2 == 0
           and (ts // 2) % _SUBLANE == 0 and (ts // 2) >= 64
           and m % (ts // 2) == 0):
        ts //= 2
    return m * _LANE, ts


def _project3d_kernel(p_ref, pts_ref, out_ref, *, eps, has_w):
    """One (batch, sublane-tile) block per grid step.

    p_ref   : SMEM (B, 12) — pre-scaled, flattened (3, 4) projection matrix
    pts_ref : VMEM (1, R, TS, 128) homogeneous-point tile, R in {3, 4}
    out_ref : VMEM (1, 2, TS, 128) normalized pixel coords tile
    """
    b = pl.program_id(0)

    # Dense (TS, 128) slabs: full sublane/lane occupancy per vreg.
    x = pts_ref[0, 0]
    y = pts_ref[0, 1]
    z = pts_ref[0, 2]

    # 3x4 projection as scalar-broadcast VPU FMAs (rows 0/1 pre-scaled by
    # 2/(W-1) and 2/(H-1) in the wrapper; row 2 unscaled so eps matches ref).
    cam_x = p_ref[b, 0] * x + p_ref[b, 1] * y + p_ref[b, 2] * z
    cam_y = p_ref[b, 4] * x + p_ref[b, 5] * y + p_ref[b, 6] * z
    cam_z = p_ref[b, 8] * x + p_ref[b, 9] * y + p_ref[b, 10] * z
    if has_w:
        w = pts_ref[0, 3]
        cam_x = cam_x + p_ref[b, 3] * w
        cam_y = cam_y + p_ref[b, 7] * w
        cam_z = cam_z + p_ref[b, 11] * w
    else:
        # Homogeneous row implicitly == 1: fold w-column in as scalar bias.
        cam_x = cam_x + p_ref[b, 3]
        cam_y = cam_y + p_ref[b, 7]
        cam_z = cam_z + p_ref[b, 11]

    # One reciprocal, reused for both rows. approx=False keeps 1e-4 tolerance.
    r = pl.reciprocal(cam_z + eps, approx=False)

    out_ref[0, 0] = (cam_x * r - 1.0).astype(out_ref.dtype)
    out_ref[0, 1] = (cam_y * r - 1.0).astype(out_ref.dtype)


def project3d(points, K, T, *, batch_size, height, width, eps=1e-7,
              channels_last=True):
    """points: (B, 4, H*W) (or (B, 3, H*W) if homogeneous row is all ones),
    K: (B, 4, 4), T: (B, 4, 4) -> (B, H, W, 2) (or (B, 2, H, W) if
    channels_last=False, which avoids the output transpose)."""
    B = batch_size
    N = height * width
    rows = points.shape[1]
    assert rows in (3, 4) and points.shape == (B, rows, N), points.shape
    assert K.shape == (B, 4, 4) and T.shape == (B, 4, 4)

    # Host-side prep: P = (K @ T)[:, :3, :] with output normalization folded
    # exactly into rows 0/1:
    #   pix0 = (x/z)/(W-1)*2 - 1 = ((2/(W-1))*x)/z - 1    (same for row 1)
    P = jnp.matmul(K, T)[:, :3, :].astype(jnp.float32)               # (B, 3, 4)
    row_scale = jnp.array(
        [2.0 / (width - 1), 2.0 / (height - 1), 1.0], dtype=jnp.float32)
    P_flat = (P * row_scale[None, :, None]).reshape(B, 12)           # SMEM

    N_pad, TS = _plan_tiles(N, B)
    M = N_pad // _LANE

    pts = points.astype(jnp.float32)
    if N_pad != N:
        # Zero-padded tail is numerically safe (0/(0+eps) -> -1) and sliced off.
        pts = jnp.pad(pts, ((0, 0), (0, 0), (0, N_pad - N)))
    pts4 = pts.reshape(B, rows, M, _LANE)      # free reshape (trailing split)

    grid = (B, M // TS)
    kernel = functools.partial(_project3d_kernel, eps=eps, has_w=(rows == 4))

    pix4 = pl.pallas_call(
        kernel,
        out_shape=jax.ShapeDtypeStruct((B, 2, M, _LANE), jnp.float32),
        grid_spec=pltpu.PrefetchScalarGridSpec(
            num_scalar_prefetch=1,             # P_flat lands in SMEM
            grid=grid,
            in_specs=[
                pl.BlockSpec((1, rows, TS, _LANE),
                             lambda b, n, p: (b, 0, n, 0)),
            ],
            out_specs=pl.BlockSpec((1, 2, TS, _LANE),
                                   lambda b, n, p: (b, 0, n, 0)),
        ),
        compiler_params=pltpu.CompilerParams(
            dimension_semantics=("parallel", "parallel")),
        cost_estimate=pl.CostEstimate(
            flops=27 * B * N_pad,
            transcendentals=B * N_pad,
            bytes_accessed=(rows + 2) * 4 * B * N_pad),
    )(P_flat, pts4)

    pix = pix4.reshape(B, 2, N_pad)[:, :, :N].reshape(B, 2, height, width)
    if not channels_last:
        return pix                                      # (B, 2, H, W), no transpose
    # Module-interface glue: (B, 2, H, W) -> (B, H, W, 2). Kept outside the
    # kernel — a lane width of 2 inside would force masked partial stores.
    return jnp.transpose(pix, (0, 2, 3, 1))


def project3d_ref(points, K, T, *, batch_size, height, width, eps=1e-7):
    """Pure-JAX reference mirroring the PyTorch forward."""
    P = jnp.matmul(K, T)[:, :3, :]
    cam = jnp.matmul(P, points)
    pix = cam[:, :2, :] / (cam[:, 2:3, :] + eps)
    pix = pix.reshape(batch_size, 2, height, width)
    pix = jnp.transpose(pix, (0, 2, 3, 1))
    pix = pix.at[..., 0].divide(width - 1)
    pix = pix.at[..., 1].divide(height - 1)
    return (pix - 0.5) * 2


if __name__ == "__main__":
    B, H, W = 2, 16, 16
    N = H * W
    key = jax.random.PRNGKey(0)
    k1, k2, _ = jax.random.split(key, 3)

    # Homogeneous 3D points (B, 4, H*W), last row = 1.
    pts_xyz = jax.random.normal(k1, (B, 3, N), dtype=jnp.float32) * 2.0
    pts_xyz = pts_xyz.at[:, 2, :].add(5.0)  # push points in front of the camera
    ones = jnp.ones((B, 1, N), dtype=jnp.float32)
    points = jnp.concatenate([pts_xyz, ones], axis=1)

    # Intrinsics K (B, 4, 4): simple pinhole camera, deterministic.
    K = jnp.tile(
        jnp.array([[W / 2.0, 0.0, W / 2.0, 0.0],
                   [0.0, H / 2.0, H / 2.0, 0.0],
                   [0.0, 0.0, 1.0, 0.0],
                   [0.0, 0.0, 0.0, 1.0]], dtype=jnp.float32)[None],
        (B, 1, 1))

    # Extrinsics T (B, 4, 4): identity plus a small deterministic perturbation.
    T = jnp.tile(jnp.eye(4, dtype=jnp.float32)[None], (B, 1, 1))
    T = T + 0.01 * jax.random.normal(k2, (B, 4, 4), dtype=jnp.float32)

    ref = project3d_ref(points, K, T, batch_size=B, height=H, width=W)

    # Standard (B, 4, N) path — exact module semantics.
    out = project3d(points, K, T, batch_size=B, height=H, width=W)
    out = jax.block_until_ready(out)
    assert out.shape == (B, H, W, 2), out.shape
    assert jnp.allclose(out, ref, atol=1e-4, rtol=1e-4), \
        float(jnp.max(jnp.abs(out - ref)))

    # Reduced-traffic (B, 3, N) path (homogeneous row assumed == 1).
    out3 = project3d(points[:, :3, :], K, T, batch_size=B, height=H, width=W)
    out3 = jax.block_until_ready(out3)
    assert jnp.allclose(out3, ref, atol=1e-4, rtol=1e-4), \
        float(jnp.max(jnp.abs(out3 - ref)))

    print("KERNEL_OK")
</pallas_src>

<mosaic_0001>
module attributes {stable_mosaic.version = 11 : i64} {
  func.func @_project3d_kernel(%arg0: i32, %arg1: i32, %arg2: memref<2x12xf32, #tpu.memory_space<smem>>, %arg3: memref<1x4x2x128xf32, #tpu.memory_space<vmem>>, %arg4: memref<1x2x2x128xf32, #tpu.memory_space<vmem>>) attributes {dimension_semantics = [#tpu.dimension_semantics<parallel>, #tpu.dimension_semantics<parallel>], iteration_bounds = array<i64: 2, 1>, scalar_prefetch = 1 : i64, scratch_operands = 0 : i64, tpu.core_type = #tpu.core_type<tc>, window_params = [{transform_indices = @transform_0, window_bounds = array<i64: 1, 4, 2, 128>}, {transform_indices = @transform_1, window_bounds = array<i64: 1, 2, 2, 128>}]} {
    %c0 = arith.constant 0 : index
    %c0_0 = arith.constant 0 : index
    %c0_1 = arith.constant 0 : index
    %c0_2 = arith.constant 0 : index
    %0 = vector.load %arg3[%c0, %c0_0, %c0_1, %c0_2] : memref<1x4x2x128xf32, #tpu.memory_space<vmem>>, vector<1x1x2x128xf32>
    %1 = vector.shape_cast %0 : vector<1x1x2x128xf32> to vector<2x128xf32>
    %c0_3 = arith.constant 0 : index
    %c1 = arith.constant 1 : index
    %c0_4 = arith.constant 0 : index
    %c0_5 = arith.constant 0 : index
    %2 = vector.load %arg3[%c0_3, %c1, %c0_4, %c0_5] : memref<1x4x2x128xf32, #tpu.memory_space<vmem>>, vector<1x1x2x128xf32>
    %3 = vector.shape_cast %2 : vector<1x1x2x128xf32> to vector<2x128xf32>
    %c0_6 = arith.constant 0 : index
    %c2 = arith.constant 2 : index
    %c0_7 = arith.constant 0 : index
    %c0_8 = arith.constant 0 : index
    %4 = vector.load %arg3[%c0_6, %c2, %c0_7, %c0_8] : memref<1x4x2x128xf32, #tpu.memory_space<vmem>>, vector<1x1x2x128xf32>
    %5 = vector.shape_cast %4 : vector<1x1x2x128xf32> to vector<2x128xf32>
    %6 = arith.index_cast %arg0 : i32 to index
    %c0_9 = arith.constant 0 : index
    %7 = memref.load %arg2[%6, %c0_9] : memref<2x12xf32, #tpu.memory_space<smem>>
    %8 = vector.broadcast %7 : f32 to vector<2x128xf32>
    %9 = arith.mulf %8, %1 : vector<2x128xf32>
    %10 = arith.index_cast %arg0 : i32 to index
    %c1_10 = arith.constant 1 : index
    %11 = memref.load %arg2[%10, %c1_10] : memref<2x12xf32, #tpu.memory_space<smem>>
    %12 = vector.broadcast %11 : f32 to vector<2x128xf32>
    %13 = arith.mulf %12, %3 : vector<2x128xf32>
    %14 = arith.addf %9, %13 : vector<2x128xf32>
    %15 = arith.index_cast %arg0 : i32 to index
    %c2_11 = arith.constant 2 : index
    %16 = memref.load %arg2[%15, %c2_11] : memref<2x12xf32, #tpu.memory_space<smem>>
    %17 = vector.broadcast %16 : f32 to vector<2x128xf32>
    %18 = arith.mulf %17, %5 : vector<2x128xf32>
    %19 = arith.addf %14, %18 : vector<2x128xf32>
    %20 = arith.index_cast %arg0 : i32 to index
    %c4 = arith.constant 4 : index
    %21 = memref.load %arg2[%20, %c4] : memref<2x12xf32, #tpu.memory_space<smem>>
    %22 = vector.broadcast %21 : f32 to vector<2x128xf32>
    %23 = arith.mulf %22, %1 : vector<2x128xf32>
    %24 = arith.index_cast %arg0 : i32 to index
    %c5 = arith.constant 5 : index
    %25 = memref.load %arg2[%24, %c5] : memref<2x12xf32, #tpu.memory_space<smem>>
    %26 = vector.broadcast %25 : f32 to vector<2x128xf32>
    %27 = arith.mulf %26, %3 : vector<2x128xf32>
    %28 = arith.addf %23, %27 : vector<2x128xf32>
    %29 = arith.index_cast %arg0 : i32 to index
    %c6 = arith.constant 6 : index
    %30 = memref.load %arg2[%29, %c6] : memref<2x12xf32, #tpu.memory_space<smem>>
    %31 = vector.broadcast %30 : f32 to vector<2x128xf32>
    %32 = arith.mulf %31, %5 : vector<2x128xf32>
    %33 = arith.addf %28, %32 : vector<2x128xf32>
    %34 = arith.index_cast %arg0 : i32 to index
    %c8 = arith.constant 8 : index
    %35 = memref.load %arg2[%34, %c8] : memref<2x12xf32, #tpu.memory_space<smem>>
    %36 = vector.broadcast %35 : f32 to vector<2x128xf32>
    %37 = arith.mulf %36, %1 : vector<2x128xf32>
    %38 = arith.index_cast %arg0 : i32 to index
    %c9 = arith.constant 9 : index
    %39 = memref.load %arg2[%38, %c9] : memref<2x12xf32, #tpu.memory_space<smem>>
    %40 = vector.broadcast %39 : f32 to vector<2x128xf32>
    %41 = arith.mulf %40, %3 : vector<2x128xf32>
    %42 = arith.addf %37, %41 : vector<2x128xf32>
    %43 = arith.index_cast %arg0 : i32 to index
    %c10 = arith.constant 10 : index
    %44 = memref.load %arg2[%43, %c10] : memref<2x12xf32, #tpu.memory_space<smem>>
    %45 = vector.broadcast %44 : f32 to vector<2x128xf32>
    %46 = arith.mulf %45, %5 : vector<2x128xf32>
    %47 = arith.addf %42, %46 : vector<2x128xf32>
    %c0_12 = arith.constant 0 : index
    %c3 = arith.constant 3 : index
    %c0_13 = arith.constant 0 : index
    %c0_14 = arith.constant 0 : index
    %48 = vector.load %arg3[%c0_12, %c3, %c0_13, %c0_14] : memref<1x4x2x128xf32, #tpu.memory_space<vmem>>, vector<1x1x2x128xf32>
    %49 = vector.shape_cast %48 : vector<1x1x2x128xf32> to vector<2x128xf32>
    %50 = arith.index_cast %arg0 : i32 to index
    %c3_15 = arith.constant 3 : index
    %51 = memref.load %arg2[%50, %c3_15] : memref<2x12xf32, #tpu.memory_space<smem>>
    %52 = vector.broadcast %51 : f32 to vector<2x128xf32>
    %53 = arith.mulf %52, %49 : vector<2x128xf32>
    %54 = arith.addf %19, %53 : vector<2x128xf32>
    %55 = arith.index_cast %arg0 : i32 to index
    %c7 = arith.constant 7 : index
    %56 = memref.load %arg2[%55, %c7] : memref<2x12xf32, #tpu.memory_space<smem>>
    %57 = vector.broadcast %56 : f32 to vector<2x128xf32>
    %58 = arith.mulf %57, %49 : vector<2x128xf32>
    %59 = arith.addf %33, %58 : vector<2x128xf32>
    %60 = arith.index_cast %arg0 : i32 to index
    %c11 = arith.constant 11 : index
    %61 = memref.load %arg2[%60, %c11] : memref<2x12xf32, #tpu.memory_space<smem>>
    %62 = vector.broadcast %61 : f32 to vector<2x128xf32>
    %63 = arith.mulf %62, %49 : vector<2x128xf32>
    %64 = arith.addf %47, %63 : vector<2x128xf32>
    %cst = arith.constant 1.000000e-07 : f32
    %65 = vector.broadcast %cst : f32 to vector<2x128xf32>
    %66 = arith.addf %64, %65 : vector<2x128xf32>
    %67 = tpu.reciprocal %66 : vector<2x128xf32> -> vector<2x128xf32>
    %68 = arith.mulf %54, %67 : vector<2x128xf32>
    %cst_16 = arith.constant 1.000000e+00 : f32
    %69 = vector.broadcast %cst_16 : f32 to vector<2x128xf32>
    %70 = arith.subf %68, %69 : vector<2x128xf32>
    %c0_17 = arith.constant 0 : index
    %c0_18 = arith.constant 0 : index
    %c0_19 = arith.constant 0 : index
    %c0_20 = arith.constant 0 : index
    %71 = vector.load %arg4[%c0_17, %c0_18, %c0_19, %c0_20] : memref<1x2x2x128xf32, #tpu.memory_space<vmem>>, vector<1x1x2x128xf32>
    %72 = vector.shape_cast %71 : vector<1x1x2x128xf32> to vector<2x128xf32>
    %73 = vector.shape_cast %70 : vector<2x128xf32> to vector<1x1x2x128xf32>
    tpu.vector_store %arg4[%c0_17, %c0_18, %c0_19, %c0_20], %73 {strides = array<i32>} : memref<1x2x2x128xf32, #tpu.memory_space<vmem>>, vector<1x1x2x128xf32>,
    %74 = arith.mulf %59, %67 : vector<2x128xf32>
    %cst_21 = arith.constant 1.000000e+00 : f32
    %75 = vector.broadcast %cst_21 : f32 to vector<2x128xf32>
    %76 = arith.subf %74, %75 : vector<2x128xf32>
    %c0_22 = arith.constant 0 : index
    %c1_23 = arith.constant 1 : index
    %c0_24 = arith.constant 0 : index
    %c0_25 = arith.constant 0 : index
    %77 = vector.load %arg4[%c0_22, %c1_23, %c0_24, %c0_25] : memref<1x2x2x128xf32, #tpu.memory_space<vmem>>, vector<1x1x2x128xf32>
    %78 = vector.shape_cast %77 : vector<1x1x2x128xf32> to vector<2x128xf32>
    %79 = vector.shape_cast %76 : vector<2x128xf32> to vector<1x1x2x128xf32>
    tpu.vector_store %arg4[%c0_22, %c1_23, %c0_24, %c0_25], %79 {strides = array<i32>} : memref<1x2x2x128xf32, #tpu.memory_space<vmem>>, vector<1x1x2x128xf32>,
    return
  }
  func.func @transform_0(%arg0: i32, %arg1: i32, %arg2: memref<2x12xf32, #tpu.memory_space<smem>>) -> (i32, i32, i32, i32) {
    %c0_i32 = arith.constant 0 : i32
    %c0_i32_0 = arith.constant 0 : i32
    %c0_i32_1 = arith.constant 0 : i32
    return %arg0, %c0_i32, %arg1, %c0_i32_0 : i32, i32, i32, i32
  }
  func.func @transform_1(%arg0: i32, %arg1: i32, %arg2: memref<2x12xf32, #tpu.memory_space<smem>>) -> (i32, i32, i32, i32) {
    %c0_i32 = arith.constant 0 : i32
    %c0_i32_0 = arith.constant 0 : i32
    %c0_i32_1 = arith.constant 0 : i32
    return %arg0, %c0_i32, %arg1, %c0_i32_0 : i32, i32, i32, i32
  }
}

</mosaic_0001>

<bundles_post_ra>
// kernel: tpu_custom_call.1
= control target key start
LH: loop header
LB: loop body
LE: loop exit
PB: predicated region body
PF: predicated region fallthrough
CT: control target
= control target key end

     0   :  { %s572_s12 = smov [#allocation3]   ;;  %s737_s0 = inlined_call_operand.hbm [shape: f32[2,12], index: 0, kind: input, shape index: {}]   ;;  %s738_s1 = inlined_call_operand.hbm [shape: f32[2,4,2,128], index: 1, kind: input, shape index: {}]   ;;  %s739_s2 = inlined_call_operand.hbm [shape: f32[2,2,2,128], index: 2, kind: output, shape index: {}]  }
   0x1   :  { %s8_s11 = sshll.u32 %s737_s0, 4  ;;  %s9_s11 = int_to_ptr.hbm [resolvable:$true] %s8_s11 }
   0x2   :  { %11 = dma.hbm_to_smem %s9_s11, 32, %s572_s12, [#allocation2] }
   0x3   :  { %538 = dma.done.wait [#allocation2], 32 }
   0x4   :  { %539 = vsyncadd [#allocation2], 4294967264 }
   0x5   :  { %14 = sfence }
   0x6   :  { %15 = vsyncpa [#allocation5], 0 }
   0x7   :  { %17 = vsyncpa [#allocation5 + $0x1], 0 }
   0x8   :  { %18 = vsyncpa [#allocation6], 0 }
   0x9   :  { %20 = vsyncpa [#allocation6 + $0x1], 0  ;;  %s595_s13 = smov 0   ;;  %s597_s14 = smov 0  }
   0xa   :  { %s599_s15 = smov 0   ;;  %s601_s16 = smov 0  }
   0xb   :  { %s603_s17 = smov 0   ;;  %s605_s0 = smov 0  }
   0xc LB: > { %s351_s18 = sadd.s32 4294967295, %s570_s0   ;;  %s352_s19 = sadd.s32 4294967294, %s570_s0   ;;  %s570_s0 = sphi %s605_s0, %s26_s0   ;;  %s566_s17 = sphi %s603_s17, %s748_s17   ;;  %s562_s16 = sphi %s601_s16, %s747_s16   ;;  %s558_s15 = sphi %s599_s15, %s746_s15   ;;  %s554_s14 = sphi %s597_s14, %s745_s14   ;;  %s550_s13 = sphi %s595_s13, %s744_s13  }
   0xd   : > { %s38_s20 = sadd.s32 1, %s566_s17  ;;  %s47_s21 = sadd.s32 1, %s558_s15 }
   0xe   : > { %p40_p0 = scmp.ge.s32.totalorder %s38_s20, 2  ;;  %p54_p1 = scmp.ne.s32.totalorder %s558_s15, %s554_s14 }
   0xf   : > { %p55_p2 = scmp.eq.s32.totalorder %s570_s0, 0  ;;  %p60_p3 = scmp.ne.s32.totalorder %s554_s14, %s550_s13 }
  0x10   : > { %s750_s20 = smov (%p40_p0, %s38_s20), 0  ;;  %p61_p5 = scmp.eq.s32.totalorder %s351_s18, 0 }
  0x11   : > { %p636_p4 = por %p55_p2, %p54_p1  ;;  %s42_s23 = ssub.s32 %s566_s17, %s750_s20 }
  0x12   : > { %p86_p6 = scmp.eq.s32.totalorder %s351_s18, 1  ;;  %p45_p7 = scmp.eq.s32.totalorder %s42_s23, 0 }
  0x13   : > { %p642_p8 = por %p61_p5, %p60_p3  ;;  %p92_p10 = scmp.eq.s32.totalorder %s352_s19, 1 }
  0x14   : > { %p646_p9 = por %p86_p6, %p54_p1  ;;  %p354_p12 = scmp.ge.s32.totalorder %s570_s0, 2 }
  0x15   : > { %s651_s26 = scalar_select %p45_p7, %s558_s15, %s47_s21  }
  0x16   : > { %p653_p11 = por %p92_p10, %p60_p3  ;;  %p387_p13 = scmp.lt.s32.totalorder %s570_s0, 2 }
  0x17   : > { %s112_s28 = sand.u32 1, %s558_s15   ;;  %s373_s30 = sshll.u32 %s566_s17, 3 }
  0x18   : > { %s355_s29 = sshll.u32 %s112_s28, 3  ;;  %s122_s5 = scalar_lea.hbm %s738_s1, %s373_s30 }
  0x19   : > { %s116_s6 = scalar_lea.vmem [#allocation4], %s355_s29  ;;  %s123_s8 = sshll.u32 %s122_s5, 4  ;;  %s124_s8 = int_to_ptr.hbm [resolvable:$true] %s123_s8 }
  0x1a   : > { %s125_s7 = sshll.u32 %s116_s6, 4  ;;  %p380_p0 = pnand %p387_p13, %p636_p4  ;;  %s126_s7 = int_to_ptr.vmem [resolvable:$true] %s125_s7 }
  0x1b   : > { %p358_p1 = scmp.ge.s32.totalorder %s570_s0, 1  ;;  %s113_s9 = scalar_lea.sflag [#allocation5], %s112_s28 }
  0x1c   : > { %s573_s10 = smov 32   ;;  %s574_s11 = smov 2  }
  0x1d   : > { %382 = dma.hbm_to_vmem [thread:$0]  (!%p380_p0), %s124_s8, 128, %s126_s7, %s113_s9, %s573_s10, %s573_s10, %s574_s11  }
  0x1e   : > { %p133_p2 = scmp.lt.s32.totalorder %s570_s0, 3 }
  0x20   : > { %p134_p3 = pnand %p358_p1, %p133_p2 }
  0x21   : > { %s669_s12 = sand.u32 (!%p134_p3), 1, %s554_s14  }
  0x22   : > { %137 = sbr.rel (%p134_p3) target bundleno = 86 (0x56), region = 24  ;;  %s359_s18 = sshll.u32 (!%p134_p3), %s669_s12, 3 }
  0x23   : > { %s140_s19 = scalar_lea.sflag (!%p134_p3), [#allocation5], %s669_s12  ;;  %s143_s21 = scalar_lea.vmem (!%p134_p3), [#allocation4], %s359_s18 }
  0x27   : > { %541 = dma.done.wait (%p642_p8), %s140_s19, 128  }
  0x28   : > { %543 = vsyncadd (%p642_p8), %s140_s19, 4294967168  ;;  %s678_s22 = sshll.u32 %s562_s16, 7  ;;  %v163_v0 = vld [vmem:[%s143_s21] sm:$0x3]  ;;  %v361_v1 = vld [vmem:[%s143_s21 + $0x2] sm:$0x3] }
  0x29   : > { %s196_s23 = sadd.s32 8, %s678_s22  ;;  %s200_s28 = sadd.s32 9, %s678_s22  ;;  %v362_v3 = vld [vmem:[%s143_s21 + $0x4] sm:$0x3]  ;;  %v364_v8 = vld [vmem:[%s143_s21 + $0x6] sm:$0x3] }
  0x2a   : > { %s197_s29 = sld [smem:[#allocation3 + %s196_s23]]  ;;  %s205_s30 = sadd.s32 10, %s678_s22 }
  0x2b   : > { %s172_s3 = sadd.s32 1, %s678_s22  ;;  %s201_s4 = sld [smem:[#allocation3 + %s200_s28]] }
  0x2c   : > { %s685_s24 = sld [smem:[#allocation3 + %s678_s22]]  ;;  %s222_s6 = sadd.s32 11, %s678_s22 }
  0x2d   : > { %s206_s5 = sld [smem:[#allocation3 + %s205_s30]]  ;;  %s182_s9 = sadd.s32 4, %s678_s22 }
  0x2e   : > { %s688_s7 = sld [smem:[#allocation3 + %s172_s3]]  ;;  %s186_s10 = sadd.s32 5, %s678_s22 }
  0x2f   : > { %s223_s8 = sld [smem:[#allocation3 + %s222_s6]]  ;;  %s177_s11 = sadd.s32 2, %s678_s22 }
  0x30   : > { %v198_v2 = vstv %s197_s29  ;;  %s183_s18 = sld [smem:[#allocation3 + %s182_s9]]  ;;  %s191_s23 = sadd.s32 6, %s678_s22 }
  0x31   : > { %v199_v4 = vmul.f32 %v198_v2, %v163_v0  ;;  %v202_v5 = vstv %s201_s4  ;;  %s187_s19 = sld [smem:[#allocation3 + %s186_s10]]  ;;  %s212_s29 = sadd.s32 3, %s678_s22 }
  0x32   : > { %v203_v6 = vmul.f32 %v361_v1, %v202_v5  ;;  %s178_s28 = sld [smem:[#allocation3 + %s177_s11]]  ;;  %s217_s3 = sadd.s32 7, %s678_s22  ;;  %v170_v14 = vstv %s685_s24 }
  0x33   : > { %v207_v7 = vstv %s206_s5  ;;  %s192_s30 = sld [smem:[#allocation3 + %s191_s23]]  ;;  %v171_v20 = vmul.f32 %v170_v14, %v163_v0  ;;  %s360_s21 = sshll.u32 %s669_s12, 2 }
  0x34   : > { %v204_v9 = vadd.f32 %v203_v6, %v199_v4  ;;  %v208_v10 = vmul.f32 %v362_v3, %v207_v7  ;;  %v174_v15 = vstv %s688_s7  ;;  %s213_s4 = sld [smem:[#allocation3 + %s212_s29]]  ;;  %s374_s22 = sshll.u32 %s562_s16, 2 }
  0x35   : > { %v224_v11 = vstv %s223_s8  ;;  %s218_s6 = sld [smem:[#allocation3 + %s217_s3]]  ;;  %v175_v21 = vmul.f32 %v361_v1, %v174_v15  ;;  %s262_s7 = scalar_lea.hbm %s739_s2, %s374_s22 }
  0x36   : > { %v209_v12 = vadd.f32 %v208_v10, %v204_v9  ;;  %v225_v13 = vmul.f32 %v364_v8, %v224_v11  ;;  %v184_v18 = vstv %s183_s18  ;;  %s162_s8 = scalar_lea.vmem [#allocation7], %s360_s21  ;;  %s265_s10 = sshll.u32 %s262_s7, 4  ;;  %s266_s10 = int_to_ptr.hbm [resolvable:$true] %s265_s10 }
  0x37   : > { %v188_v19 = vstv %s187_s19  ;;  %v185_v23 = vmul.f32 %v184_v18, %v163_v0  ;;  %v176_v26 = vadd.f32 %v175_v21, %v171_v20  ;;  %s263_s9 = sshll.u32 %s162_s8, 4  ;;  %s250_s16 = scalar_lea.sflag [#allocation6], %s669_s12  ;;  %s264_s9 = int_to_ptr.vmem [resolvable:$true] %s263_s9 }
  0x38   : > { %v226_v16 = vadd.f32 %v225_v13, %v209_v12  ;;  %v179_v22 = vstv %s178_s28  ;;  %v189_v24 = vmul.f32 %v361_v1, %v188_v19  ;;  %s500_s11 = sshra.s32 %s266_s10, 4  ;;  %s506_s28 = scalar_lea.hbm %s739_s2, 8  ;;  %s501_s11 = int_to_ptr.hbm [resolvable:$true] %s500_s11 }
  0x39   : > { %v193_v25 = vstv %s192_s30  ;;  %v180_v27 = vmul.f32 %v362_v3, %v179_v22  ;;  %s502_s18 = scalar_lea.hbm %s501_s11, 4  ;;  %p507_p7 = scmp.lt.s32.totalorder %s501_s11, %s739_s2 }
  0x3a   : > { %v227_v17 = vadd.f32 1e-07, %v226_v16  ;;  %v214_v28 = vstv %s213_s4  ;;  %v190_v29 = vadd.f32 %v189_v24, %v185_v23  ;;  %v194_v30 = vmul.f32 %v362_v3, %v193_v25  ;;  %p503_p4 = scmp.ne.s32.totalorder %s501_s11, %s502_s18  ;;  %p508_p8 = scmp.lt.s32.totalorder %s506_s28, %s502_s18 }
  0x3b   : > { %v219_v31 = vstv %s218_s6  ;;  %v181_v33 = vadd.f32 %v180_v27, %v176_v26  ;;  %v215_v35 = vmul.f32 %v364_v8, %v214_v28 }
  0x3c   : > { %442 = vrcp.f32 %v227_v17  ;;  %vm233_vm0 = vweird.f32 %v227_v17  ;;  %v239_v36 = vand.u32 2147483648, %v227_v17  ;;  %v220_v37 = vmul.f32 %v364_v8, %v219_v31  ;;  %p504_p5 = pnand %p503_p4, %p646_p9  ;;  %p509_p10 = por %p508_p8, %p507_p7 }
  0x3d   : > { %v237_v39 = vand.u32 2147483647, %v227_v17  ;;  %v195_v40 = vadd.f32 %v194_v30, %v190_v29  ;;  %v216_v43 = vadd.f32 %v215_v35, %v181_v33 }
  0x3e   : > { %v240_v42 = vor.u32 1.1754944e-38, %v239_v36  ;;  %p505_p6 = pneg %p504_p5 }
  0x3f   : > { %vm238_vm3 = vcmp.eq.f32.partialorder %v237_v39, 8.507059e+37  ;;  %v221_v45 = vadd.f32 %v220_v37, %v195_v40 }
  0x40   : > { %p510_p13 = pnand %p509_p10, %p505_p6 }
  0x42   : > { %v443_v32 = vpop.eup %442 }
  0x43   : > { %v229_v34 = vmul.f32 %v443_v32, %v227_v17  ;;  %vm234_vm1 = vweird.f32 %v443_v32 }
  0x44   : > { %vm235_vm2 = vmor %vm233_vm0, %vm234_vm1 }
  0x45   : > { %v230_v38 = vsub.f32 1.0, %v229_v34 }
  0x47   : > { %v231_v41 = vmul.f32 %v443_v32, %v230_v38 }
  0x49   : > { %v232_v44 = vadd.f32 %v443_v32, %v231_v41 }
  0x4b   : > { %v236_v46 = vsel %vm235_vm2, %v443_v32, %v232_v44 }
  0x4c   : > { %v241_v47 = vsel %vm238_vm3, %v240_v42, %v236_v46 }
  0x4d   : > { %v242_v48 = vmul.f32 %v241_v47, %v216_v43  ;;  %v245_v49 = vmul.f32 %v241_v47, %v221_v45 }
  0x4f   : > { %v365_v50 = vadd.f32 -1.0, %v242_v48  ;;  %v366_v51 = vadd.f32 -1.0, %v245_v49 }
  0x51   : > { %244 = vst [vmem:[%s162_s8] sm:$0x3] %v365_v50 }
  0x52   : > { %367 = vst [vmem:[%s162_s8 + $0x2] sm:$0x3] %v366_v51 }
  0x53   : > { %513 = shalt.err (!%p510_p13)
}
  0x54   : > { %s575_s12 = smov 32   ;;  %s576_s3 = smov 2  }
  0x55   : > { %377 = dma.vmem_to_hbm [thread:$0]  (%p646_p9), %s264_s9, 64, %s266_s10, %s250_s16, %s575_s12, %s575_s12, %s576_s3  }
  0x56 PF: > { %s280_s4 = sand.u32 1, %s550_s13   ;;  %p384_p0 = pnand %p354_p12, %p653_p11 }
  0x57   : > { %s281_s6 = scalar_lea.sflag [#allocation6], %s280_s4 }
  0x58   : > { %p385_p1 = pneg %p384_p0 }
  0x5a   : > { %545 = dma.done.wait (%p385_p1), %s281_s6, 64  }
  0x5b   : > { %547 = vsyncadd (%p385_p1), %s281_s6, 4294967232  ;;  %s26_s0 = sadd.s32 1, %s570_s0   ;;  %s744_s13 = smov %s554_s14 }
  0x5c   : > { %p23_p2 = scmp.ge.s32.totalorder %s26_s0, 4   ;;  %s745_s14 = smov %s558_s15 }
  0x5d   : > { %s746_s15 = smov %s651_s26  ;;  %s747_s16 = smov %s566_s17 }
  0x5e   : > { %s748_s17 = smov %s750_s20  ;;  %25 = sbr.rel (!%p23_p2) target bundleno = 12 (0xc), region = 73 }
  0x63   :  { %287 = vsyncpa [#allocation5], 1 }
  0x64   :  { %289 = vsyncpa [#allocation5 + $0x1], 1 }
  0x65   :  { %290 = vsyncpa [#allocation6], 1 }
  0x66   :  { %292 = vsyncpa [#allocation6 + $0x1], 1 }

</bundles_post_ra>
